<compile_context>
chip_gen: v7x
topology: tpu7x:2x2x1
jax: 0.10.0
libtpu: 0.0.40
codegen_flags: <defaults>
</compile_context>

<pallas_src>
import jax
import jax.numpy as jnp
from jax import lax
from jax.experimental import pallas as pl
from jax.experimental.pallas import tpu as pltpu


# ----------------------------- model config ---------------------------------
EMB_DIM = 8
FEAT_DIM = 64
NUM_CATE_FIELDS = 4
NUM_CONT_FIELDS = 3
NUM_CROSS_FEATS = 50
NUM_CROSS_FIELDS = 6          # number of cross-feature indices per sample
FC_DIMS = (32, 32)
BATCH = 8

EMB_VOCAB = FEAT_DIM - NUM_CONT_FIELDS              # nn.Embedding num_embeddings (61)
DEEP_IN = NUM_CONT_FIELDS + NUM_CATE_FIELDS * EMB_DIM
FOLDED_ROWS = NUM_CATE_FIELDS * EMB_VOCAB           # 244


# ------------------------------ Pallas kernel --------------------------------
def wide_and_deep_kernel(cont_ref,       # (bt, NUM_CONT_FIELDS)          f32
                         cate_idx_ref,   # (bt, NUM_CATE_FIELDS)          i32
                         cross_idx_ref,  # (bt, NUM_CROSS_FIELDS)         i32
                         w1c_ref,        # (NUM_CONT_FIELDS, 32)          f32
                         w1e_fold_ref,   # (FOLDED_ROWS, 32)              f32  (emb @ W1_emb, per field)
                         b12_ref,        # (2, 32)                        f32  (row0=b1, row1=b2)
                         w2_ref,         # (32, 32)                       f32
                         wod_ref,        # (32, 1)                        f32  (out-layer deep weight)
                         wide_w_ref,     # (NUM_CROSS_FEATS, 1)           f32  (wide_table * w_out_wide)
                         bias_ref,       # (1,)  SMEM                     f32  (b_out + wide_bias*w_out_wide)
                         out_ref):       # (bt, 1)
    f32 = jnp.float32
    bt = cont_ref.shape[0]

    # ---- deep layer 1: continuous contribution   (bt,3) @ (3,32)
    h = jnp.dot(cont_ref[...], w1c_ref[...], preferred_element_type=f32)

    # ---- deep layer 1: categorical contribution (embedding gather fused as one-hot matmul)
    # field f occupies rows [f*V, (f+1)*V) of the folded table.
    idxc = cate_idx_ref[...]                                             # (bt, F) int32
    iota_fv = lax.broadcasted_iota(jnp.int32, (bt, FOLDED_ROWS), 1)
    oh = jnp.zeros((bt, FOLDED_ROWS), f32)
    for f in range(NUM_CATE_FIELDS):
        oh = oh + (idxc[:, f:f + 1] + f * EMB_VOCAB == iota_fv).astype(f32)
    h = h + jnp.dot(oh, w1e_fold_ref[...], preferred_element_type=f32)   # (bt, 32)
    h = jnp.maximum(h + b12_ref[0:1, :], 0.0)

    # ---- deep layer 2: Linear(32 -> 32) + ReLU
    h = jnp.dot(h, w2_ref[...], preferred_element_type=f32) + b12_ref[1:2, :]
    h = jnp.maximum(h, 0.0)

    # ---- wide part (gather fused): multi-hot counts @ (wide_table * w_out_wide)
    idxx = cross_idx_ref[...]                                            # (bt, J) int32
    iota_c = lax.broadcasted_iota(jnp.int32, (bt, NUM_CROSS_FEATS), 1)
    mh = jnp.zeros((bt, NUM_CROSS_FEATS), f32)
    for j in range(NUM_CROSS_FIELDS):
        mh = mh + (idxx[:, j:j + 1] == iota_c).astype(f32)
    y_wide = jnp.dot(mh, wide_w_ref[...], preferred_element_type=f32)    # (bt, 1), already *w_out_wide

    # ---- output layer: Linear(concat([y_deep, y_wide], 1)) + sigmoid (split along K)
    logit = jnp.dot(h, wod_ref[...], preferred_element_type=f32) + y_wide + bias_ref[0]
    out_ref[...] = jax.nn.sigmoid(logit)


# --------------------------- one-time param prep ------------------------------
def prepare_params(params):
    """One-time preprocessing so the per-call path has zero XLA slice/gather ops."""
    w1 = params["w1"]                                    # (DEEP_IN, 32)
    w1c = w1[:NUM_CONT_FIELDS, :]                        # (3, 32)
    w1e = w1[NUM_CONT_FIELDS:, :]                        # (32, 32)
    emb = params["emb_table"]                            # (V, E)
    # fold the embedding table through layer-1, per categorical field -> (F*V, 32)
    folded = jnp.concatenate(
        [emb @ w1e[f * EMB_DIM:(f + 1) * EMB_DIM, :] for f in range(NUM_CATE_FIELDS)],
        axis=0)
    wout = params["w_out"]                               # (33, 1)
    wod = wout[:FC_DIMS[-1], :]                          # (32, 1)
    wow = wout[FC_DIMS[-1], 0]                           # scalar: out weight for wide feature
    wide_scaled = params["wide_table"] * wow             # (NUM_CROSS_FEATS, 1)
    bias_total = params["b_out"][0, 0] + params["wide_bias"][0, 0] * wow
    b12 = jnp.concatenate([params["b1"], params["b2"]], axis=0)   # (2, 32)
    return {
        "w1c": w1c.astype(jnp.float32),
        "w1e_fold": folded.astype(jnp.float32),
        "b12": b12.astype(jnp.float32),
        "w2": params["w2"].astype(jnp.float32),
        "wod": wod.astype(jnp.float32),
        "wide_scaled": wide_scaled.astype(jnp.float32),
        "bias_total": jnp.reshape(bias_total, (1,)).astype(jnp.float32),
    }


# ------------------------------ forward wrapper --------------------------------
def wide_and_deep_pallas(continuous_value, categorical_index, cross_feat_index, kp,
                         batch_tile=512):
    """Forward pass. All gathers + dense math run inside one Pallas kernel."""
    B = continuous_value.shape[0]
    bt = B if B <= batch_tile else batch_tile            # tile == full batch at small B
    Bp = ((B + bt - 1) // bt) * bt
    if Bp != B:
        pad = Bp - B
        continuous_value = jnp.pad(continuous_value, ((0, pad), (0, 0)))
        categorical_index = jnp.pad(categorical_index, ((0, pad), (0, 0)))
        cross_feat_index = jnp.pad(cross_feat_index, ((0, pad), (0, 0)))

    act_spec = lambda cols: pl.BlockSpec((bt, cols), lambda i: (i, 0))
    rep_spec = lambda shape: pl.BlockSpec(shape, lambda i: (0, 0))   # weights stay resident

    out = pl.pallas_call(
        wide_and_deep_kernel,
        out_shape=jax.ShapeDtypeStruct((Bp, 1), jnp.float32),
        grid=(Bp // bt,),
        in_specs=[
            act_spec(NUM_CONT_FIELDS),
            act_spec(NUM_CATE_FIELDS),
            act_spec(NUM_CROSS_FIELDS),
            rep_spec((NUM_CONT_FIELDS, FC_DIMS[0])),
            rep_spec((FOLDED_ROWS, FC_DIMS[0])),
            rep_spec((2, FC_DIMS[0])),
            rep_spec((FC_DIMS[0], FC_DIMS[1])),
            rep_spec((FC_DIMS[1], 1)),
            rep_spec((NUM_CROSS_FEATS, 1)),
            pl.BlockSpec(memory_space=pltpu.MemorySpace.SMEM),
        ],
        out_specs=pl.BlockSpec((bt, 1), lambda i: (i, 0)),
        compiler_params=pltpu.CompilerParams(dimension_semantics=("parallel",)),
    )(continuous_value.astype(jnp.float32),
      categorical_index.astype(jnp.int32),
      cross_feat_index.astype(jnp.int32),
      kp["w1c"], kp["w1e_fold"], kp["b12"], kp["w2"],
      kp["wod"], kp["wide_scaled"], kp["bias_total"])
    return out[:B]


# ----------------------------- pure-JAX reference ----------------------------
def wide_and_deep_ref(continuous_value, categorical_index, cross_feat_index, params):
    B = continuous_value.shape[0]
    cate_emb = params["emb_table"][categorical_index].reshape(B, -1)
    deep_in = jnp.concatenate([continuous_value, cate_emb], axis=1)
    h = jnp.maximum(deep_in @ params["w1"] + params["b1"], 0.0)
    h = jnp.maximum(h @ params["w2"] + params["b2"], 0.0)
    cross_w = params["wide_table"][cross_feat_index][..., 0]
    y_wide = jnp.sum(cross_w, axis=1, keepdims=True) + params["wide_bias"][0, 0]
    y = jnp.concatenate([h, y_wide], axis=1)
    logit = y @ params["w_out"] + params["b_out"]
    return jax.nn.sigmoid(logit)


# ---------------------------------- main --------------------------------------
if __name__ == "__main__":
    key = jax.random.PRNGKey(0)
    keys = jax.random.split(key, 12)

    params = {
        "emb_table":  0.1 * jax.random.normal(keys[0], (EMB_VOCAB, EMB_DIM), jnp.float32),
        "wide_table": 0.1 * jax.random.normal(keys[1], (NUM_CROSS_FEATS, 1), jnp.float32),
        "wide_bias":  jnp.zeros((1, 1), jnp.float32),
        "w1":  0.1 * jax.random.normal(keys[2], (DEEP_IN, FC_DIMS[0]), jnp.float32),
        "b1":  0.01 * jnp.ones((1, FC_DIMS[0]), jnp.float32),
        "w2":  0.1 * jax.random.normal(keys[3], (FC_DIMS[0], FC_DIMS[1]), jnp.float32),
        "b2":  0.01 * jnp.ones((1, FC_DIMS[1]), jnp.float32),
        "w_out": 0.1 * jax.random.normal(keys[4], (FC_DIMS[1] + 1, 1), jnp.float32),
        "b_out": jnp.zeros((1, 1), jnp.float32),
    }
    kparams = prepare_params(params)   # one-time: slice / fold weights, fold scalars

    continuous_value = jax.random.normal(keys[5], (BATCH, NUM_CONT_FIELDS), jnp.float32)
    categorical_index = jax.random.randint(keys[6], (BATCH, NUM_CATE_FIELDS), 0, EMB_VOCAB,
                                           dtype=jnp.int32)
    cross_feat_index = jax.random.randint(keys[7], (BATCH, NUM_CROSS_FIELDS), 0, NUM_CROSS_FEATS,
                                          dtype=jnp.int32)

    fwd = jax.jit(lambda c, ci, xi, kp: wide_and_deep_pallas(c, ci, xi, kp))
    y = fwd(continuous_value, categorical_index, cross_feat_index, kparams)
    y = jax.block_until_ready(y)

    y_ref = wide_and_deep_ref(continuous_value, categorical_index, cross_feat_index, params)
    assert y.shape == (BATCH, 1)
    assert jnp.allclose(y, y_ref, atol=1e-5, rtol=1e-5), (y, y_ref)

    print("KERNEL_OK")
</pallas_src>

<mosaic_0001>
module attributes {stable_mosaic.version = 11 : i64} {
  func.func @wide_and_deep_kernel(%arg0: i32, %arg1: memref<8x3xf32, #tpu.memory_space<vmem>>, %arg2: memref<8x4xi32, #tpu.memory_space<vmem>>, %arg3: memref<8x6xi32, #tpu.memory_space<vmem>>, %arg4: memref<3x32xf32, #tpu.memory_space<vmem>>, %arg5: memref<244x32xf32, #tpu.memory_space<vmem>>, %arg6: memref<2x32xf32, #tpu.memory_space<vmem>>, %arg7: memref<32x32xf32, #tpu.memory_space<vmem>>, %arg8: memref<32x1xf32, #tpu.memory_space<vmem>>, %arg9: memref<50x1xf32, #tpu.memory_space<vmem>>, %arg10: memref<1xf32, #tpu.memory_space<smem>>, %arg11: memref<8x1xf32, #tpu.memory_space<vmem>>) attributes {dimension_semantics = [#tpu.dimension_semantics<parallel>], iteration_bounds = array<i64: 1>, scalar_prefetch = 0 : i64, scratch_operands = 0 : i64, tpu.core_type = #tpu.core_type<tc>, window_params = [{transform_indices = @transform_0, window_bounds = array<i64: 8, 3>}, {transform_indices = @transform_1, window_bounds = array<i64: 8, 4>}, {transform_indices = @transform_2, window_bounds = array<i64: 8, 6>}, {pipeline_mode = #tpu.pipeline_mode<synchronous>, transform_indices = @transform_3, window_bounds = array<i64: 3, 32>}, {pipeline_mode = #tpu.pipeline_mode<synchronous>, transform_indices = @transform_4, window_bounds = array<i64: 244, 32>}, {pipeline_mode = #tpu.pipeline_mode<synchronous>, transform_indices = @transform_5, window_bounds = array<i64: 2, 32>}, {pipeline_mode = #tpu.pipeline_mode<synchronous>, transform_indices = @transform_6, window_bounds = array<i64: 32, 32>}, {pipeline_mode = #tpu.pipeline_mode<synchronous>, transform_indices = @transform_7, window_bounds = array<i64: 32, 1>}, {pipeline_mode = #tpu.pipeline_mode<synchronous>, transform_indices = @transform_8, window_bounds = array<i64: 50, 1>}, {transform_indices = @transform_9, window_bounds = array<i64: 1>}, {transform_indices = @transform_10, window_bounds = array<i64: 8, 1>}]} {
    %c0 = arith.constant 0 : index
    %c0_0 = arith.constant 0 : index
    %0 = vector.load %arg1[%c0, %c0_0] : memref<8x3xf32, #tpu.memory_space<vmem>>, vector<8x3xf32>
    %c0_1 = arith.constant 0 : index
    %c0_2 = arith.constant 0 : index
    %1 = vector.load %arg4[%c0_1, %c0_2] : memref<3x32xf32, #tpu.memory_space<vmem>>, vector<3x32xf32>
    %cst = arith.constant dense<0.000000e+00> : vector<8x32xf32>
    %2 = tpu.matmul %0, %1, %cst {dimension_numbers = #tpu.dot_dimension_numbers<[1], [0], [0], [1], [0, 0, 1, 1], [], []>} : vector<8x3xf32>, vector<3x32xf32>, vector<8x32xf32> -> vector<8x32xf32>
    %c0_3 = arith.constant 0 : index
    %c0_4 = arith.constant 0 : index
    %3 = vector.load %arg2[%c0_3, %c0_4] : memref<8x4xi32, #tpu.memory_space<vmem>>, vector<8x4xi32>
    %4 = tpu.iota {dimensions = array<i32: 1>} : vector<8x244xi32>
    %cst_5 = arith.constant 0.000000e+00 : f32
    %5 = vector.broadcast %cst_5 : f32 to vector<8x244xf32>
    %6 = vector.extract_strided_slice %3 {offsets = [0, 0], sizes = [8, 1], strides = [1, 1]} : vector<8x4xi32> to vector<8x1xi32>
    %c0_i32 = arith.constant 0 : i32
    %7 = vector.broadcast %c0_i32 : i32 to vector<8x1xi32>
    %8 = arith.addi %6, %7 : vector<8x1xi32>
    %9 = vector.broadcast %8 : vector<8x1xi32> to vector<8x244xi32>
    %10 = arith.cmpi eq, %9, %4 : vector<8x244xi32>
    %11 = arith.extui %10 : vector<8x244xi1> to vector<8x244xi32>
    %12 = arith.sitofp %11 : vector<8x244xi32> to vector<8x244xf32>
    %13 = arith.addf %5, %12 : vector<8x244xf32>
    %14 = vector.extract_strided_slice %3 {offsets = [0, 1], sizes = [8, 1], strides = [1, 1]} : vector<8x4xi32> to vector<8x1xi32>
    %c61_i32 = arith.constant 61 : i32
    %15 = vector.broadcast %c61_i32 : i32 to vector<8x1xi32>
    %16 = arith.addi %14, %15 : vector<8x1xi32>
    %17 = vector.broadcast %16 : vector<8x1xi32> to vector<8x244xi32>
    %18 = arith.cmpi eq, %17, %4 : vector<8x244xi32>
    %19 = arith.extui %18 : vector<8x244xi1> to vector<8x244xi32>
    %20 = arith.sitofp %19 : vector<8x244xi32> to vector<8x244xf32>
    %21 = arith.addf %13, %20 : vector<8x244xf32>
    %22 = vector.extract_strided_slice %3 {offsets = [0, 2], sizes = [8, 1], strides = [1, 1]} : vector<8x4xi32> to vector<8x1xi32>
    %c122_i32 = arith.constant 122 : i32
    %23 = vector.broadcast %c122_i32 : i32 to vector<8x1xi32>
    %24 = arith.addi %22, %23 : vector<8x1xi32>
    %25 = vector.broadcast %24 : vector<8x1xi32> to vector<8x244xi32>
    %26 = arith.cmpi eq, %25, %4 : vector<8x244xi32>
    %27 = arith.extui %26 : vector<8x244xi1> to vector<8x244xi32>
    %28 = arith.sitofp %27 : vector<8x244xi32> to vector<8x244xf32>
    %29 = arith.addf %21, %28 : vector<8x244xf32>
    %30 = vector.extract_strided_slice %3 {offsets = [0, 3], sizes = [8, 1], strides = [1, 1]} : vector<8x4xi32> to vector<8x1xi32>
    %c183_i32 = arith.constant 183 : i32
    %31 = vector.broadcast %c183_i32 : i32 to vector<8x1xi32>
    %32 = arith.addi %30, %31 : vector<8x1xi32>
    %33 = vector.broadcast %32 : vector<8x1xi32> to vector<8x244xi32>
    %34 = arith.cmpi eq, %33, %4 : vector<8x244xi32>
    %35 = arith.extui %34 : vector<8x244xi1> to vector<8x244xi32>
    %36 = arith.sitofp %35 : vector<8x244xi32> to vector<8x244xf32>
    %37 = arith.addf %29, %36 : vector<8x244xf32>
    %c0_6 = arith.constant 0 : index
    %c0_7 = arith.constant 0 : index
    %38 = vector.load %arg5[%c0_6, %c0_7] : memref<244x32xf32, #tpu.memory_space<vmem>>, vector<244x32xf32>
    %cst_8 = arith.constant dense<0.000000e+00> : vector<8x32xf32>
    %39 = tpu.matmul %37, %38, %cst_8 {dimension_numbers = #tpu.dot_dimension_numbers<[1], [0], [0], [1], [0, 0, 1, 1], [], []>} : vector<8x244xf32>, vector<244x32xf32>, vector<8x32xf32> -> vector<8x32xf32>
    %40 = arith.addf %2, %39 : vector<8x32xf32>
    %c0_9 = arith.constant 0 : index
    %c0_10 = arith.constant 0 : index
    %41 = vector.load %arg6[%c0_9, %c0_10] : memref<2x32xf32, #tpu.memory_space<vmem>>, vector<1x32xf32>
    %42 = vector.broadcast %41 : vector<1x32xf32> to vector<8x32xf32>
    %43 = arith.addf %40, %42 : vector<8x32xf32>
    %cst_11 = arith.constant 0.000000e+00 : f32
    %44 = vector.broadcast %cst_11 : f32 to vector<8x32xf32>
    %45 = arith.maximumf %43, %44 : vector<8x32xf32>
    %c0_12 = arith.constant 0 : index
    %c0_13 = arith.constant 0 : index
    %46 = vector.load %arg7[%c0_12, %c0_13] : memref<32x32xf32, #tpu.memory_space<vmem>>, vector<32x32xf32>
    %cst_14 = arith.constant dense<0.000000e+00> : vector<8x32xf32>
    %47 = tpu.matmul %45, %46, %cst_14 {dimension_numbers = #tpu.dot_dimension_numbers<[1], [0], [0], [1], [0, 0, 1, 1], [], []>} : vector<8x32xf32>, vector<32x32xf32>, vector<8x32xf32> -> vector<8x32xf32>
    %c1 = arith.constant 1 : index
    %c0_15 = arith.constant 0 : index
    %48 = vector.load %arg6[%c1, %c0_15] : memref<2x32xf32, #tpu.memory_space<vmem>>, vector<1x32xf32>
    %49 = vector.broadcast %48 : vector<1x32xf32> to vector<8x32xf32>
    %50 = arith.addf %47, %49 : vector<8x32xf32>
    %cst_16 = arith.constant 0.000000e+00 : f32
    %51 = vector.broadcast %cst_16 : f32 to vector<8x32xf32>
    %52 = arith.maximumf %50, %51 : vector<8x32xf32>
    %c0_17 = arith.constant 0 : index
    %c0_18 = arith.constant 0 : index
    %53 = vector.load %arg3[%c0_17, %c0_18] : memref<8x6xi32, #tpu.memory_space<vmem>>, vector<8x6xi32>
    %54 = tpu.iota {dimensions = array<i32: 1>} : vector<8x50xi32>
    %cst_19 = arith.constant 0.000000e+00 : f32
    %55 = vector.broadcast %cst_19 : f32 to vector<8x50xf32>
    %56 = vector.extract_strided_slice %53 {offsets = [0, 0], sizes = [8, 1], strides = [1, 1]} : vector<8x6xi32> to vector<8x1xi32>
    %57 = vector.broadcast %56 : vector<8x1xi32> to vector<8x50xi32>
    %58 = arith.cmpi eq, %57, %54 : vector<8x50xi32>
    %59 = arith.extui %58 : vector<8x50xi1> to vector<8x50xi32>
    %60 = arith.sitofp %59 : vector<8x50xi32> to vector<8x50xf32>
    %61 = arith.addf %55, %60 : vector<8x50xf32>
    %62 = vector.extract_strided_slice %53 {offsets = [0, 1], sizes = [8, 1], strides = [1, 1]} : vector<8x6xi32> to vector<8x1xi32>
    %63 = vector.broadcast %62 : vector<8x1xi32> to vector<8x50xi32>
    %64 = arith.cmpi eq, %63, %54 : vector<8x50xi32>
    %65 = arith.extui %64 : vector<8x50xi1> to vector<8x50xi32>
    %66 = arith.sitofp %65 : vector<8x50xi32> to vector<8x50xf32>
    %67 = arith.addf %61, %66 : vector<8x50xf32>
    %68 = vector.extract_strided_slice %53 {offsets = [0, 2], sizes = [8, 1], strides = [1, 1]} : vector<8x6xi32> to vector<8x1xi32>
    %69 = vector.broadcast %68 : vector<8x1xi32> to vector<8x50xi32>
    %70 = arith.cmpi eq, %69, %54 : vector<8x50xi32>
    %71 = arith.extui %70 : vector<8x50xi1> to vector<8x50xi32>
    %72 = arith.sitofp %71 : vector<8x50xi32> to vector<8x50xf32>
    %73 = arith.addf %67, %72 : vector<8x50xf32>
    %74 = vector.extract_strided_slice %53 {offsets = [0, 3], sizes = [8, 1], strides = [1, 1]} : vector<8x6xi32> to vector<8x1xi32>
    %75 = vector.broadcast %74 : vector<8x1xi32> to vector<8x50xi32>
    %76 = arith.cmpi eq, %75, %54 : vector<8x50xi32>
    %77 = arith.extui %76 : vector<8x50xi1> to vector<8x50xi32>
    %78 = arith.sitofp %77 : vector<8x50xi32> to vector<8x50xf32>
    %79 = arith.addf %73, %78 : vector<8x50xf32>
    %80 = vector.extract_strided_slice %53 {offsets = [0, 4], sizes = [8, 1], strides = [1, 1]} : vector<8x6xi32> to vector<8x1xi32>
    %81 = vector.broadcast %80 : vector<8x1xi32> to vector<8x50xi32>
    %82 = arith.cmpi eq, %81, %54 : vector<8x50xi32>
    %83 = arith.extui %82 : vector<8x50xi1> to vector<8x50xi32>
    %84 = arith.sitofp %83 : vector<8x50xi32> to vector<8x50xf32>
    %85 = arith.addf %79, %84 : vector<8x50xf32>
    %86 = vector.extract_strided_slice %53 {offsets = [0, 5], sizes = [8, 1], strides = [1, 1]} : vector<8x6xi32> to vector<8x1xi32>
    %87 = vector.broadcast %86 : vector<8x1xi32> to vector<8x50xi32>
    %88 = arith.cmpi eq, %87, %54 : vector<8x50xi32>
    %89 = arith.extui %88 : vector<8x50xi1> to vector<8x50xi32>
    %90 = arith.sitofp %89 : vector<8x50xi32> to vector<8x50xf32>
    %91 = arith.addf %85, %90 : vector<8x50xf32>
    %c0_20 = arith.constant 0 : index
    %c0_21 = arith.constant 0 : index
    %92 = vector.load %arg9[%c0_20, %c0_21] : memref<50x1xf32, #tpu.memory_space<vmem>>, vector<50x1xf32>
    %cst_22 = arith.constant dense<0.000000e+00> : vector<8x1xf32>
    %93 = tpu.matmul %91, %92, %cst_22 {dimension_numbers = #tpu.dot_dimension_numbers<[1], [0], [0], [1], [0, 0, 1, 1], [], []>} : vector<8x50xf32>, vector<50x1xf32>, vector<8x1xf32> -> vector<8x1xf32>
    %c0_23 = arith.constant 0 : index
    %c0_24 = arith.constant 0 : index
    %94 = vector.load %arg8[%c0_23, %c0_24] : memref<32x1xf32, #tpu.memory_space<vmem>>, vector<32x1xf32>
    %cst_25 = arith.constant dense<0.000000e+00> : vector<8x1xf32>
    %95 = tpu.matmul %52, %94, %cst_25 {dimension_numbers = #tpu.dot_dimension_numbers<[1], [0], [0], [1], [0, 0, 1, 1], [], []>} : vector<8x32xf32>, vector<32x1xf32>, vector<8x1xf32> -> vector<8x1xf32>
    %96 = arith.addf %95, %93 : vector<8x1xf32>
    %c0_26 = arith.constant 0 : index
    %97 = memref.load %arg10[%c0_26] : memref<1xf32, #tpu.memory_space<smem>>
    %98 = vector.broadcast %97 : f32 to vector<8x1xf32>
    %99 = arith.addf %96, %98 : vector<8x1xf32>
    %100 = arith.negf %99 : vector<8x1xf32>
    %101 = math.exp %100 : vector<8x1xf32>
    %cst_27 = arith.constant 1.000000e+00 : f32
    %102 = vector.broadcast %cst_27 : f32 to vector<8x1xf32>
    %103 = arith.addf %102, %101 : vector<8x1xf32>
    %104 = arith.divf %102, %103 : vector<8x1xf32>
    %c0_28 = arith.constant 0 : index
    %c0_29 = arith.constant 0 : index
    %105 = vector.load %arg11[%c0_28, %c0_29] : memref<8x1xf32, #tpu.memory_space<vmem>>, vector<8x1xf32>
    tpu.vector_store %arg11[%c0_28, %c0_29], %104 {strides = array<i32>} : memref<8x1xf32, #tpu.memory_space<vmem>>, vector<8x1xf32>,
    return
  }
  func.func @transform_0(%arg0: i32) -> (i32, i32) {
    %c0_i32 = arith.constant 0 : i32
    %c0_i32_0 = arith.constant 0 : i32
    return %arg0, %c0_i32 : i32, i32
  }
  func.func @transform_1(%arg0: i32) -> (i32, i32) {
    %c0_i32 = arith.constant 0 : i32
    %c0_i32_0 = arith.constant 0 : i32
    return %arg0, %c0_i32 : i32, i32
  }
  func.func @transform_2(%arg0: i32) -> (i32, i32) {
    %c0_i32 = arith.constant 0 : i32
    %c0_i32_0 = arith.constant 0 : i32
    return %arg0, %c0_i32 : i32, i32
  }
  func.func @transform_3(%arg0: i32) -> (i32, i32) {
    %c0_i32 = arith.constant 0 : i32
    %c0_i32_0 = arith.constant 0 : i32
    %c0_i32_1 = arith.constant 0 : i32
    return %c0_i32, %c0_i32_0 : i32, i32
  }
  func.func @transform_4(%arg0: i32) -> (i32, i32) {
    %c0_i32 = arith.constant 0 : i32
    %c0_i32_0 = arith.constant 0 : i32
    %c0_i32_1 = arith.constant 0 : i32
    return %c0_i32, %c0_i32_0 : i32, i32
  }
  func.func @transform_5(%arg0: i32) -> (i32, i32) {
    %c0_i32 = arith.constant 0 : i32
    %c0_i32_0 = arith.constant 0 : i32
    %c0_i32_1 = arith.constant 0 : i32
    return %c0_i32, %c0_i32_0 : i32, i32
  }
  func.func @transform_6(%arg0: i32) -> (i32, i32) {
    %c0_i32 = arith.constant 0 : i32
    %c0_i32_0 = arith.constant 0 : i32
    %c0_i32_1 = arith.constant 0 : i32
    return %c0_i32, %c0_i32_0 : i32, i32
  }
  func.func @transform_7(%arg0: i32) -> (i32, i32) {
    %c0_i32 = arith.constant 0 : i32
    %c0_i32_0 = arith.constant 0 : i32
    %c0_i32_1 = arith.constant 0 : i32
    return %c0_i32, %c0_i32_0 : i32, i32
  }
  func.func @transform_8(%arg0: i32) -> (i32, i32) {
    %c0_i32 = arith.constant 0 : i32
    %c0_i32_0 = arith.constant 0 : i32
    %c0_i32_1 = arith.constant 0 : i32
    return %c0_i32, %c0_i32_0 : i32, i32
  }
  func.func @transform_9(%arg0: i32) -> i32 {
    %c0_i32 = arith.constant 0 : i32
    %c0_i32_0 = arith.constant 0 : i32
    return %c0_i32 : i32
  }
  func.func @transform_10(%arg0: i32) -> (i32, i32) {
    %c0_i32 = arith.constant 0 : i32
    %c0_i32_0 = arith.constant 0 : i32
    return %arg0, %c0_i32 : i32, i32
  }
}

</mosaic_0001>

<bundles_post_ra>
// kernel: _lambda_.1
= control target key start
LH: loop header
LB: loop body
LE: loop exit
PB: predicated region body
PF: predicated region fallthrough
CT: control target
= control target key end

     0   :  { %v765_v0 = vmov 0   ;;  %v766_v2 = vmov 2   ;;  %v767_v5 = vmov 0.0|0.0   ;;  %v768_v11 = vmov 0.0   ;;  %s1053_s1 = inlined_call_operand.vmem [shape: s32[8,4], index: 1, kind: input, shape index: {}]   ;;  %s1054_s4 = inlined_call_operand.vmem [shape: f32[244,32], index: 4, kind: input, shape index: {}]   ;;  %s1055_s2 = inlined_call_operand.vmem [shape: s32[8,6], index: 2, kind: input, shape index: {}]   ;;  %s1056_s3 = inlined_call_operand.vmem [shape: f32[3,32], index: 3, kind: input, shape index: {}]   ;;  %s1057_s0 = inlined_call_operand.vmem [shape: f32[8,3], index: 0, kind: input, shape index: {}]   ;;  %s1058_s6 = inlined_call_operand.vmem [shape: f32[32,32], index: 6, kind: input, shape index: {}]   ;;  %s1059_s5 = inlined_call_operand.vmem [shape: f32[2,32], index: 5, kind: input, shape index: {}]   ;;  %s1060_s8 = inlined_call_operand.vmem [shape: f32[50,1], index: 8, kind: input, shape index: {}]   ;;  %s1061_s7 = inlined_call_operand.vmem [shape: f32[32,1], index: 7, kind: input, shape index: {}]   ;;  %s1062_s9 = inlined_call_operand.<no memory space> [shape: f32[1], index: 9, kind: input, shape index: {}]   ;;  %s1063_s10 = inlined_call_operand.vmem [shape: f32[8,1], index: 10, kind: output, shape index: {}]  }
   0x1   :  { %751 = vset.pattern.permute.xlu0 %v765_v0  ;;  %v38_v1 = vld [vmem:[%s1053_s1] sm:$0xff]  ;;  %753 = vset.pattern.permute.xlu1 %v766_v2  ;;  %v90_v6 = vld [vmem:[%s1054_s4 + $0x8] sm:$0xff]  ;;  %v91_v7 = vld [vmem:[%s1054_s4 + $0x10] sm:$0xff]  ;;  %v769_v14 = vmov 1   ;;  %v770_v17 = vmov 3   ;;  %vm202_vm0 = vcmask 1042432  }
   0x2   :  { %v89_v3 = vld [vmem:[%s1054_s4] sm:$0xff]  ;;  %43 = vperm.xlu0 %751, %v38_v1   ;;  %v65_v4 = vadd.s32 122, %v38_v1  ;;  %676 = vmatprep.subr.bf16.mxu0 %v767_v5  ;;  %v92_v8 = vld [vmem:[%s1054_s4 + $0x18] sm:$0xff]  ;;  %v53_v9 = vadd.s32 61, %v38_v1  ;;  %v77_v12 = vadd.s32 183, %v38_v1  ;;  %v94_v16 = vld [vmem:[%s1054_s4 + $0x28] sm:$0xff] }
   0x3   :  { %v677_v10 = vpack.c.bf16 %v90_v6, %v89_v3  ;;  %632 = vmatprep.subr.mxu1 %v768_v11  ;;  %v680_v13 = vpack.c.bf16 %v92_v8, %v91_v7  ;;  %v93_v15 = vld [vmem:[%s1054_s4 + $0x20] sm:$0xff]  ;;  %v95_v20 = vld [vmem:[%s1054_s4 + $0x30] sm:$0xff]  ;;  %v96_v21 = vld [vmem:[%s1054_s4 + $0x38] sm:$0xff]  ;;  %vm198_vm1 = vcmask 23552   ;;  %vm771_vm2 = vmmov 0  }
   0x4   :  { %67 = vperm.xlu1 %753, %v65_v4   ;;  %v367_v18 = vld [vmem:[%s1055_s2] sm:$0xff]  ;;  %v683_v19 = vpack.c.bf16 %v94_v16, %v93_v15  ;;  %v686_v22 = vpack.c.bf16 %v96_v21, %v95_v20  ;;  %v98_v25 = vld [vmem:[%s1054_s4 + $0x48] sm:$0xff]  ;;  %634 = vmatprep.mubr.msk.f32.mxu1 %vm771_vm2, %v768_v11  ;;  %v99_v28 = vld [vmem:[%s1054_s4 + $0x50] sm:$0xff]  ;;  %v772_v30 = vmov 5   ;;  %v773_v34 = vmov 4  }
   0x5   :  { %678 = vmatpush1.bf16.msra.mxu0 %v677_v10  ;;  %v37_v23 = vld [vmem:[%s1056_s3] sm:$0x7]  ;;  %v100_v29 = vld [vmem:[%s1054_s4 + $0x58] sm:$0xff]  ;;  %v102_v33 = vld [vmem:[%s1054_s4 + $0x68] sm:$0xff]  ;;  %vm124_vm3 = vcmask 1043456   ;;  %vm120_vm12 = vcmask 949248  }
   0x6   :  { %752 = vset.pattern.permute.xlu0 %v769_v14  ;;  %679 = vmatprep.subr.bf16.mxu0 %v767_v5  ;;  %v97_v24 = vld [vmem:[%s1054_s4 + $0x40] sm:$0xff]  ;;  %v692_v31 = vpack.c.bf16 %v100_v29, %v99_v28  ;;  %v103_v36 = vld [vmem:[%s1054_s4 + $0x70] sm:$0xff]  ;;  %v104_v37 = vld [vmem:[%s1054_s4 + $0x78] sm:$0xff] }
   0x7   :  { %55 = vperm.xlu0 %752, %v53_v9   ;;  %v36_v26 = vld [vmem:[%s1057_s0] sm:$0xff]  ;;  %633 = vmatpush3.msk.msra.mxu1 %vm202_vm0, %v37_v23  ;;  %v689_v27 = vpack.c.bf16 %v98_v25, %v97_v24  ;;  %v698_v38 = vpack.c.bf16 %v104_v37, %v103_v36  ;;  %v106_v40 = vld [vmem:[%s1054_s4 + $0x88] sm:$0xff]  ;;  %v107_v42 = vld [vmem:[%s1054_s4 + $0x90] sm:$0xff]  ;;  %vm292_vm0 = vcmask 261120  }
   0x8   :  { %754 = vset.pattern.permute.xlu1 %v770_v17  ;;  %635 = vmatmul.mubr.msk.f32.vlgmr.msra.gmra.mrb[0].mxu1 %vm198_vm1, %v36_v26  ;;  %v101_v32 = vld [vmem:[%s1054_s4 + $0x60] sm:$0xff]  ;;  %v108_v43 = vld [vmem:[%s1054_s4 + $0x98] sm:$0xff]  ;;  %v110_v46 = vld [vmem:[%s1054_s4 + $0xa8] sm:$0xff] }
   0x9   :  { %79 = vperm.xlu1 %754, %v77_v12   ;;  %681 = vmatpush1.bf16.msra.mxu0 %v680_v13  ;;  %v695_v35 = vpack.c.bf16 %v102_v33, %v101_v32  ;;  %v105_v39 = vld [vmem:[%s1054_s4 + $0x80] sm:$0xff]  ;;  %v704_v44 = vpack.c.bf16 %v108_v43, %v107_v42  ;;  %v111_v48 = vld [vmem:[%s1054_s4 + $0xb0] sm:$0xff]  ;;  %v112_v49 = vld [vmem:[%s1054_s4 + $0xb8] sm:$0xff] }
   0xa   :  { %682 = vmatprep.subr.bf16.mxu0 %v767_v5  ;;  %721 = vmatprep.subr.bf16.mxu1 %v767_v5  ;;  %v701_v41 = vpack.c.bf16 %v106_v40, %v105_v39  ;;  %v109_v45 = vld [vmem:[%s1054_s4 + $0xa0] sm:$0xff]  ;;  %v710_v50 = vpack.c.bf16 %v112_v49, %v111_v48  ;;  %v114_v52 = vld [vmem:[%s1054_s4 + $0xc8] sm:$0xff]  ;;  %v115_v54 = vld [vmem:[%s1054_s4 + $0xd0] sm:$0xff] }
   0xb   :  { %376 = vperm.xlu0 %752, %v367_v18   ;;  %645 = vmatprep.mubr.msk.f32.mxu1 %vm771_vm2, %v768_v11  ;;  %v707_v47 = vpack.c.bf16 %v110_v46, %v109_v45  ;;  %v113_v51 = vld [vmem:[%s1054_s4 + $0xc0] sm:$0xff]  ;;  %v116_v55 = vld [vmem:[%s1054_s4 + $0xd8] sm:$0xff]  ;;  %v118_v58 = vld [vmem:[%s1054_s4 + $0xe8] sm:$0xff] }
   0xc   :  { %v713_v53 = vpack.c.bf16 %v114_v52, %v113_v51  ;;  %v716_v56 = vpack.c.bf16 %v116_v55, %v115_v54  ;;  %v117_v57 = vld [vmem:[%s1054_s4 + $0xe0] sm:$0xff]  ;;  %v119_v60 = vld [vmem:[%s1054_s4 + $0xf0] sm:$0xf]  ;;  %v284_v62 = vld [vmem:[%s1058_s6 + $0x8] sm:$0xff] }
   0xd   :  { %755 = vset.pattern.permute.xlu1 %v765_v0  ;;  %684 = vmatpush1.bf16.msra.mxu0 %v683_v19  ;;  %v719_v59 = vpack.c.bf16 %v118_v58, %v117_v57  ;;  %v283_v61 = vld [vmem:[%s1058_s6] sm:$0xff]  ;;  %v39_v0 = vlaneseq  ;;  %v285_v23 = vld [vmem:[%s1058_s6 + $0x10] sm:$0xff]  ;;  %v286_v24 = vld [vmem:[%s1058_s6 + $0x18] sm:$0xff] }
   0xe   :  { %369 = vperm.xlu1 %755, %v367_v18   ;;  %685 = vmatprep.subr.bf16.mxu0 %v767_v5  ;;  %v722_v63 = vpack.c.bf16 %v284_v62, %v283_v61  ;;  %v725_v26 = vpack.c.bf16 %v286_v24, %v285_v23  ;;  %v599_v32 = vld [vmem:[%s1059_s5] ss:$0 sm:$0xff]  ;;  %v411_v36 = vld [vmem:[%s1060_s8 + $0x8] sm:$0xff]  ;;  %v412_v43 = vld [vmem:[%s1060_s8 + $0x10] sm:$0xff] }
   0xf   :  { %757 = vset.pattern.permute.xlu0 %v770_v17  ;;  %v963_v1 = vand.u32 127, %v39_v0  ;;  %v415_v51 = vld [vmem:[%s1060_s8 + $0x28] sm:$0xff]  ;;  %v495_v57 = vld [vmem:[%s1061_s7] sm:$0xff]  ;;  %v416_v61 = vld [vmem:[%s1060_s8 + $0x30] sm:$0x3] }
  0x10   :  { %390 = vperm.xlu0 %757, %v367_v18   ;;  %723 = vmatpush3.bf16.msra.mxu1 %v722_v63  ;;  %v496_v58 = vld [vmem:[%s1061_s7 + $0x8] sm:$0xff]  ;;  %v497_v0 = vld [vmem:[%s1061_s7 + $0x10] sm:$0xff] }
  0x11   :  { %687 = vmatpush1.bf16.msra.mxu0 %v686_v22  ;;  %724 = vmatprep.subr.bf16.mxu1 %v767_v5  ;;  %v737_v62 = vpack.c.bf16 %v496_v58, %v495_v57 }
  0x12   :  { %756 = vset.pattern.permute.xlu1 %v766_v2  ;;  %688 = vmatprep.subr.bf16.mxu0 %v767_v5  ;;  %v41_v2 = vadd.s32 128, %v963_v1 }
  0x13   :  { %383 = vperm.xlu1 %756, %v367_v18  }
  0x14   :  { %760 = vset.pattern.permute.xlu0 %v772_v30  ;;  %726 = vmatpush3.bf16.msra.mxu1 %v725_v26 }
  0x15   :  { %690 = vmatpush1.bf16.msra.mxu0 %v689_v27  ;;  %727 = vmatprep.subr.bf16.mxu1 %v767_v5 }
  0x16   :  { %691 = vmatprep.subr.bf16.mxu0 %v767_v5 }
  0x17   :  { %758 = vset.pattern.permute.xlu1 %v773_v34 }
  0x18   :  { %397 = vperm.xlu1 %758, %v367_v18  }
  0x19   :  { %693 = vmatpush1.bf16.msra.mxu0 %v692_v31 }
  0x1a   :  { %694 = vmatprep.subr.bf16.mxu0 %v767_v5 }
  0x1c   :  { %759 = vset.pattern.permute.xlu1 %v772_v30 }
  0x1d   :  { %404 = vperm.xlu1 %759, %v367_v18   ;;  %696 = vmatpush1.bf16.msra.mxu0 %v695_v35  ;;  %v410_v35 = vld [vmem:[%s1060_s8] sm:$0xff] }
  0x1e   :  { %697 = vmatprep.subr.bf16.mxu0 %v767_v5 }
  0x21   :  { %699 = vmatpush1.bf16.msra.mxu0 %v698_v38 }
  0x22   :  { %700 = vmatprep.subr.bf16.mxu0 %v767_v5 }
  0x25   :  { %702 = vmatpush1.bf16.msra.mxu0 %v701_v41  ;;  %v728_v41 = vpack.c.bf16 %v411_v36, %v410_v35 }
  0x26   :  { %703 = vmatprep.subr.bf16.mxu0 %v767_v5 }
  0x29   :  { %705 = vmatpush1.bf16.msra.mxu0 %v704_v44  ;;  %v413_v44 = vld [vmem:[%s1060_s8 + $0x18] sm:$0xff] }
  0x2a   :  { %706 = vmatprep.subr.bf16.mxu0 %v767_v5  ;;  %v731_v48 = vpack.c.bf16 %v413_v44, %v412_v43 }
  0x2d   :  { %708 = vmatpush1.bf16.msra.mxu0 %v707_v47 }
  0x2e   :  { %709 = vmatprep.subr.bf16.mxu0 %v767_v5 }
  0x31   :  { %711 = vmatpush1.bf16.msra.mxu0 %v710_v50  ;;  %v414_v50 = vld [vmem:[%s1060_s8 + $0x20] sm:$0xff] }
  0x32   :  { %712 = vmatprep.subr.bf16.mxu0 %v767_v5  ;;  %v734_v54 = vpack.c.bf16 %v415_v51, %v414_v50 }
  0x35   :  { %714 = vmatpush1.bf16.msra.mxu0 %v713_v53 }
  0x36   :  { %715 = vmatprep.subr.bf16.mxu0 %v767_v5 }
  0x39   :  { %717 = vmatpush1.bf16.msra.mxu0 %v716_v56 }
  0x3a   :  { %718 = vmatprep.subr.bf16.mxu0 %v767_v5 }
  0x3d   :  { %720 = vmatpush1.bf16.msra.mxu0 %v719_v59 }
  0x3e   :  { %188 = vmatprep.subr.mxu0 %v768_v11 }
  0x41   :  { %595 = vmatpush1.msk.msra.mxu0 %vm124_vm3, %v119_v60 }
  0x81   :  { %v44_v3 = vpop.permute.xlu0 %43 }
  0x82   :  { %vm45_vm4 = vcmp.eq.s32.totalorder %v44_v3, %v963_v1  ;;  %vm46_vm5 = vcmp.eq.s32.totalorder %v44_v3, %v41_v2  ;;  %v600_v3 = vld [vmem:[%s1059_s5 + $0x1] ss:$0 sm:$0xff] }
  0x83   :  { %v68_v4 = vpop.permute.xlu1 %67  ;;  %v587_v7 = vsel %vm45_vm4, 1.0, %v768_v11  ;;  %v588_v8 = vsel %vm46_vm5, 1.0, %v768_v11  ;;  %vm421_vm5 = vcmask 1041408  }
  0x84   :  { %vm69_vm6 = vcmp.eq.s32.totalorder %v68_v4, %v963_v1  ;;  %vm70_vm7 = vcmp.eq.s32.totalorder %v68_v4, %v41_v2 }
  0x85   :  { %v591_v15 = vsel %vm69_vm6, 1.0, %v768_v11  ;;  %v592_v16 = vsel %vm70_vm7, 1.0, %v768_v11  ;;  %vm417_vm6 = vcmask 408576  }
  0x86   :  { %v56_v6 = vpop.permute.xlu0 %55 }
  0x87   :  { %vm57_vm8 = vcmp.eq.s32.totalorder %v56_v6, %v963_v1  ;;  %vm58_vm9 = vcmp.eq.s32.totalorder %v56_v6, %v41_v2 }
  0x88   :  { %v589_v9 = vsel %vm57_vm8, 1.0, %v768_v11  ;;  %v590_v10 = vsel %vm58_vm9, 1.0, %v768_v11  ;;  %v80_v12 = vpop.permute.xlu1 %79 }
  0x89   :  { %v63_v13 = vadd.f32 %v589_v9, %v587_v7  ;;  %v64_v14 = vadd.f32 %v590_v10, %v588_v8  ;;  %vm81_vm10 = vcmp.eq.s32.totalorder %v80_v12, %v963_v1  ;;  %vm82_vm11 = vcmp.eq.s32.totalorder %v80_v12, %v41_v2 }
  0x8a   :  { %v593_v17 = vsel %vm81_vm10, 1.0, %v768_v11  ;;  %v594_v18 = vsel %vm82_vm11, 1.0, %v768_v11  ;;  %v377_v30 = vpop.permute.xlu0 %376  ;;  %v573_v10 = vstv %s1062_s9 }
  0x8b   :  { %v75_v19 = vadd.f32 %v591_v15, %v63_v13  ;;  %v76_v20 = vadd.f32 %v592_v16, %v64_v14  ;;  %vm378_vm14 = vcmp.eq.s32.totalorder %v377_v30, %v963_v1 }
  0x8c   :  { %v603_v45 = vsel %vm378_vm14, 1.0, %v768_v11 }
  0x8d   :  { %v87_v21 = vadd.f32 %v593_v17, %v75_v19  ;;  %v88_v22 = vadd.f32 %v594_v18, %v76_v20  ;;  %v370_v28 = vpop.permute.xlu1 %369 }
  0x8e   :  { %vm371_vm13 = vcmp.eq.s32.totalorder %v370_v28, %v963_v1 }
  0x8f   :  { %596 = vmatprep.mubr.msk.f32.mxu0 %vm120_vm12, %v88_v22  ;;  %v602_v38 = vsel %vm371_vm13, 1.0, %v768_v11  ;;  %v391_v39 = vpop.permute.xlu0 %390 }
  0x90   :  { %193 = vmatmul.mubr.f32.vlgmr.msra.gmra.mrb[0].mxu0 %v87_v21  ;;  %v381_v47 = vadd.f32 %v603_v45, %v602_v38  ;;  %vm392_vm1 = vcmp.eq.s32.totalorder %v391_v39, %v963_v1 }
  0x91   :  { %v605_v52 = vsel %vm392_vm1, 1.0, %v768_v11 }
  0x92   :  { %v384_v29 = vpop.permute.xlu1 %383 }
  0x93   :  { %vm385_vm15 = vcmp.eq.s32.totalorder %v384_v29, %v963_v1 }
  0x94   :  { %v604_v46 = vsel %vm385_vm15, 1.0, %v768_v11 }
  0x95   :  { %v388_v49 = vadd.f32 %v604_v46, %v381_v47 }
  0x97   :  { %v398_v40 = vpop.permute.xlu1 %397  ;;  %v395_v55 = vadd.f32 %v605_v52, %v388_v49 }
  0x98   :  { %vm399_vm3 = vcmp.eq.s32.totalorder %v398_v40, %v963_v1 }
  0x99   :  { %v606_v56 = vsel %vm399_vm3, 1.0, %v768_v11 }
  0x9a   :  { %v402_v60 = vadd.f32 %v606_v56, %v395_v55 }
  0x9c   :  { %v405_v53 = vpop.permute.xlu1 %404 }
  0x9d   :  { %vm406_vm4 = vcmp.eq.s32.totalorder %v405_v53, %v963_v1  ;;  %v498_v1 = vld [vmem:[%s1061_s7 + $0x18] sm:$0xff] }
  0x9e   :  { %v607_v59 = vsel %vm406_vm4, 1.0, %v768_v11  ;;  %v740_v2 = vpack.c.bf16 %v498_v1, %v497_v0 }
  0x9f   :  { %v409_v63 = vadd.f32 %v607_v59, %v402_v60 }
  0xdb   :  { %v272_v25 = vpop.f32.mrb[0].mxu1 }
  0xdc   :  { %v636_v27 = vpop.f32.mrb[1].mxu1 }
 0x163   :  { %v194_v31 = vpop.f32.mrb[0].mxu0 }
 0x164   :  { %v273_v33 = vadd.f32 %v272_v25, %v194_v31  ;;  %v196_v34 = vpop.f32.mrb[1].mxu0 }
 0x166   :  { %v281_v37 = vadd.f32 %v599_v32, %v273_v33 }
 0x168   :  { %v282_v42 = vmax.f32 %v281_v37, 0.0 }
 0x16a   :  { %646 = vmatmul.mubr.msk.f32.vlgmr.msra.gmra.mrb[2].mxu1 %vm292_vm0, %v282_v42 }
 0x16b   :  { %729 = vmatpush3.bf16.msra.mxu1 %v728_v41  ;;  %662 = vmatprep.mubr.msk.f32.mxu1 %vm771_vm2, %v768_v11 }
 0x16c   :  { %730 = vmatprep.subr.bf16.mxu1 %v767_v5 }
 0x16f   :  { %732 = vmatpush3.bf16.msra.mxu1 %v731_v48 }
 0x170   :  { %733 = vmatprep.subr.bf16.mxu1 %v767_v5 }
 0x173   :  { %735 = vmatpush3.bf16.msra.mxu1 %v734_v54 }
 0x174   :  { %660 = vmatprep.subr.mxu1 %v768_v11 }
 0x177   :  { %661 = vmatpush3.msk.msra.mxu1 %vm421_vm5, %v416_v61 }
 0x178   :  { %663 = vmatmul.mubr.msk.f32.vlgmr.msra.gmra.mrb[4].mxu1 %vm417_vm6, %v409_v63  ;;  %736 = vmatprep.subr.bf16.mxu1 %v767_v5 }
 0x179   :  { %738 = vmatpush3.bf16.msra.mxu1 %v737_v62  ;;  %673 = vmatprep.mubr.msk.f32.mxu1 %vm771_vm2, %v768_v11  ;;  %vm581_vm2 = vcmask 7168  }
 0x17a   :  { %739 = vmatprep.subr.bf16.mxu1 %v767_v5 }
 0x17d   :  { %741 = vmatpush3.bf16.msra.mxu1 %v740_v2 }
 0x23d   :  { %v362_v4 = vpop.f32.mrb[2].mxu1 }
 0x23e   :  { %v363_v6 = vadd.f32 %v600_v3, %v362_v4  ;;  %v647_v7 = vpop.f32.mrb[3].mxu1 }
 0x240   :  { %v366_v11 = vmax.f32 %v363_v6, 0.0 }
 0x242   :  { %674 = vmatmul.mubr.msk.f32.vlgmr.msra.gmra.mrb[6].mxu1 %vm292_vm0, %v366_v11 }
 0x24b   :  { %v491_v5 = vpop.f32.mrb[4].mxu1 }
 0x24c   :  { %v664_v8 = vpop.f32.mrb[5].mxu1 }
 0x315   :  { %v568_v9 = vpop.f32.mrb[6].mxu1 }
 0x316   :  { %v569_v12 = vadd.f32 %v568_v9, %v491_v5  ;;  %v675_v13 = vpop.f32.mrb[7].mxu1 }
 0x318   :  { %v574_v14 = vadd.f32 %v573_v10, %v569_v12 }
 0x31a   :  { %v611_v15 = vmul.f32 -1.442695, %v574_v14 }
 0x31c   :  { %761 = vpow2.f32 %v611_v15 }
 0x326   :  { %v762_v16 = vpop.eup %761 }
 0x327   :  { %v578_v17 = vadd.f32 1.0, %v762_v16 }
 0x329   :  { %763 = vrcp.f32 %v578_v17 }
 0x333   :  { %v764_v18 = vpop.eup %763 }
 0x334   :  { %582 = vst.msk [vmem:[%s1063_s10] sm:$0xff] %vm581_vm2, %v764_v18 }

</bundles_post_ra>
